<compile_context>
chip_gen: v5e
topology: v5e:2x2
jax: 0.10.0
libtpu: 0.0.40
codegen_flags: <defaults>
</compile_context>

<pallas_src>
import functools

import jax
import jax.numpy as jnp
from jax.experimental import pallas as pl
from jax.experimental.pallas import tpu as pltpu


def _round_up(n, m):
    return ((n + m - 1) // m) * m


def _skin_kernel(xt_ref,
                 w1_ref, b1_ref,
                 w2_ref, b2_ref,
                 w3_ref, b3_ref,
                 w4_ref, b4_ref,
                 o_ref):
    """Fused eval-mode MLP forward over one batch tile (batch on the lane axis)."""
    xt = xt_ref[...]                       # (3, TB)   f32
    w1 = w1_ref[...]                       # (L1, 3)   f32, BN folded in

    # Block 1: Linear(3, L1) + folded BN + ReLU.  K=3 -> three VPU outer-product
    # FMAs instead of a heavily padded MXU matmul.
    h = (w1[:, 0:1] * xt[0:1, :]
         + w1[:, 1:2] * xt[1:2, :]
         + w1[:, 2:3] * xt[2:3, :]
         + b1_ref[...])                    # (L1, TB)
    h = jnp.maximum(h, 0.0)

    # Block 2: Linear(L1, L2) + folded BN + ReLU.  bf16 MXU, f32 accumulate.
    h = jnp.dot(w2_ref[...], h.astype(jnp.bfloat16),
                preferred_element_type=jnp.float32) + b2_ref[...]
    h = jnp.maximum(h, 0.0)

    # Block 3: Linear(L2, L2//2) + folded BN + ReLU.
    h = jnp.dot(w3_ref[...], h.astype(jnp.bfloat16),
                preferred_element_type=jnp.float32) + b3_ref[...]
    h = jnp.maximum(h, 0.0)

    # Head: Linear(L2//2, classes).
    logits = jnp.dot(w4_ref[...], h.astype(jnp.bfloat16),
                     preferred_element_type=jnp.float32) + b4_ref[...]  # (C, TB)

    # output_activation = Softmax over the class (sublane) axis; exact divide.
    m = jnp.max(logits, axis=0, keepdims=True)
    e = jnp.exp(logits - m)
    denom = jnp.sum(e, axis=0, keepdims=True)
    o_ref[...] = (e / denom).astype(o_ref.dtype)


def make_skin_params(key, layer1, layer2, classes):
    """Deterministic params mimicking nn.Linear / nn.BatchNorm1d default init."""
    keys = jax.random.split(key, 4)
    dims = [(3, layer1), (layer1, layer2),
            (layer2, layer2 // 2), (layer2 // 2, classes)]
    params = {}
    for i, ((fi, fo), k) in enumerate(zip(dims, keys), start=1):
        kw, kb = jax.random.split(k)
        bound = 1.0 / float(fi) ** 0.5
        params[f"w{i}"] = jax.random.uniform(kw, (fi, fo), jnp.float32, -bound, bound)
        params[f"b{i}"] = jax.random.uniform(kb, (fo,), jnp.float32, -bound, bound)
    for i, feat in zip((1, 2, 3), (layer1, layer2, layer2 // 2)):
        params[f"bn{i}"] = dict(
            gamma=jnp.ones((feat,), jnp.float32),
            beta=jnp.zeros((feat,), jnp.float32),
            mean=jnp.zeros((feat,), jnp.float32),
            var=jnp.ones((feat,), jnp.float32),
            eps=1e-5)
    return params


def fold_bn_params(params):
    """Fold eval-mode BatchNorm1d into the preceding Linear (exact, f32)."""
    folded = {}
    for i in (1, 2, 3):
        bn = params[f"bn{i}"]
        scale = bn["gamma"] / jnp.sqrt(bn["var"] + bn["eps"])
        shift = bn["beta"] - bn["mean"] * scale
        folded[f"w{i}"] = params[f"w{i}"] * scale[None, :]
        folded[f"b{i}"] = params[f"b{i}"] * scale + shift
    folded["w4"] = params["w4"]
    folded["b4"] = params["b4"]
    return folded


def prepare_kernel_operands(folded):
    """Transpose to the batch-as-lanes layout; bf16-cast the MXU weights."""
    ops = []
    for i in (1, 2, 3, 4):
        w = folded[f"w{i}"].T                         # (out_features, in_features)
        if i > 1:                                     # layers 2-4 feed the MXU
            w = w.astype(jnp.bfloat16)
        ops.append(w)
        ops.append(folded[f"b{i}"].reshape(-1, 1))    # (out_features, 1) f32 column
    return tuple(ops)


@functools.partial(jax.jit, static_argnames=("tile_b", "out_dtype"))
def skin_model_forward(x, ops, *, tile_b=8192, out_dtype=jnp.bfloat16):
    """Fused SkinModel forward (eval mode). x: (batch, 3) f32 -> (batch, classes)."""
    batch = x.shape[0]
    classes = ops[-1].shape[0]

    # Batch tile along the lane axis: multiple of 128, as large as requested.
    # Ragged final blocks are masked by Pallas, so no wrapper pad / slice copies.
    tb = min(tile_b, _round_up(batch, 128))
    grid = (pl.cdiv(batch, tb),)

    xt = x.T                                          # (3, batch): layout plumbing only

    in_specs = [pl.BlockSpec((3, tb), lambda i: (0, i))]
    # Weights / biases: full-extent blocks, constant index_map -> VMEM-resident.
    in_specs += [pl.BlockSpec(op.shape, lambda i: (0, 0)) for op in ops]
    out_specs = pl.BlockSpec((classes, tb), lambda i: (0, i))

    out_t = pl.pallas_call(
        _skin_kernel,
        grid=grid,
        out_shape=jax.ShapeDtypeStruct((classes, batch), out_dtype),
        in_specs=in_specs,
        out_specs=out_specs,
        compiler_params=pltpu.CompilerParams(
            # TODO(synk): on v7x verify both TensorCores are busy; if not, switch
            # this axis to pltpu.CORE_PARALLEL.
            dimension_semantics=("parallel",),
            vmem_limit_bytes=48 * 1024 * 1024),
    )(xt, *ops)
    return out_t.T                                    # (batch, classes)


def skin_model_reference(x, params):
    """Pure-JAX full-f32 reference of SkinModel.forward (eval mode)."""
    h = x
    for i in (1, 2, 3):
        h = h @ params[f"w{i}"] + params[f"b{i}"]
        bn = params[f"bn{i}"]
        h = (h - bn["mean"]) / jnp.sqrt(bn["var"] + bn["eps"]) * bn["gamma"] + bn["beta"]
        h = jnp.maximum(h, 0.0)
        # Dropout: identity in eval mode.
    logits = h @ params["w4"] + params["b4"]
    return jax.nn.softmax(logits, axis=1)


if __name__ == "__main__":
    # SkinModel(layer1=32, layer2=64, activation='relu', output='softmax', classes=8)
    layer1, layer2, classes = 32, 64, 8
    batch = 256

    key = jax.random.PRNGKey(0)
    k_x, k_p = jax.random.split(key)
    x = jax.random.normal(k_x, (batch, 3), jnp.float32)

    params = make_skin_params(k_p, layer1, layer2, classes)
    folded = fold_bn_params(params)
    ops = prepare_kernel_operands(folded)

    out = skin_model_forward(x, ops, tile_b=8192)
    out = jax.block_until_ready(out)

    ref = skin_model_reference(x, params)
    assert out.shape == (batch, classes)
    out_f32 = out.astype(jnp.float32)
    # bf16 MXU weights + bf16 output storage => looser tolerance than exact f32.
    assert jnp.allclose(out_f32, ref, atol=2e-2, rtol=2e-2), "mismatch vs f32 reference"
    assert jnp.allclose(jnp.sum(out_f32, axis=1), 1.0, atol=2e-2), "softmax rows must sum to 1"

    print("KERNEL_OK")
</pallas_src>

<mosaic_0001>
module attributes {stable_mosaic.version = 11 : i64} {
  func.func @_skin_kernel(%arg0: i32, %arg1: memref<3x256xf32, #tpu.memory_space<vmem>>, %arg2: memref<32x3xf32, #tpu.memory_space<vmem>>, %arg3: memref<32x1xf32, #tpu.memory_space<vmem>>, %arg4: memref<64x32xbf16, #tpu.memory_space<vmem>>, %arg5: memref<64x1xf32, #tpu.memory_space<vmem>>, %arg6: memref<32x64xbf16, #tpu.memory_space<vmem>>, %arg7: memref<32x1xf32, #tpu.memory_space<vmem>>, %arg8: memref<8x32xbf16, #tpu.memory_space<vmem>>, %arg9: memref<8x1xf32, #tpu.memory_space<vmem>>, %arg10: memref<8x256xbf16, #tpu.memory_space<vmem>>) attributes {dimension_semantics = [#tpu.dimension_semantics<parallel>], iteration_bounds = array<i64: 1>, scalar_prefetch = 0 : i64, scratch_operands = 0 : i64, tpu.core_type = #tpu.core_type<tc>, window_params = [{transform_indices = @transform_0, window_bounds = array<i64: 3, 256>}, {pipeline_mode = #tpu.pipeline_mode<synchronous>, transform_indices = @transform_1, window_bounds = array<i64: 32, 3>}, {pipeline_mode = #tpu.pipeline_mode<synchronous>, transform_indices = @transform_2, window_bounds = array<i64: 32, 1>}, {pipeline_mode = #tpu.pipeline_mode<synchronous>, transform_indices = @transform_3, window_bounds = array<i64: 64, 32>}, {pipeline_mode = #tpu.pipeline_mode<synchronous>, transform_indices = @transform_4, window_bounds = array<i64: 64, 1>}, {pipeline_mode = #tpu.pipeline_mode<synchronous>, transform_indices = @transform_5, window_bounds = array<i64: 32, 64>}, {pipeline_mode = #tpu.pipeline_mode<synchronous>, transform_indices = @transform_6, window_bounds = array<i64: 32, 1>}, {pipeline_mode = #tpu.pipeline_mode<synchronous>, transform_indices = @transform_7, window_bounds = array<i64: 8, 32>}, {pipeline_mode = #tpu.pipeline_mode<synchronous>, transform_indices = @transform_8, window_bounds = array<i64: 8, 1>}, {transform_indices = @transform_9, window_bounds = array<i64: 8, 256>}]} {
    %c0 = arith.constant 0 : index
    %c0_0 = arith.constant 0 : index
    %0 = vector.load %arg1[%c0, %c0_0] : memref<3x256xf32, #tpu.memory_space<vmem>>, vector<3x256xf32>
    %c0_1 = arith.constant 0 : index
    %c0_2 = arith.constant 0 : index
    %1 = vector.load %arg2[%c0_1, %c0_2] : memref<32x3xf32, #tpu.memory_space<vmem>>, vector<32x3xf32>
    %2 = vector.extract_strided_slice %1 {offsets = [0, 0], sizes = [32, 1], strides = [1, 1]} : vector<32x3xf32> to vector<32x1xf32>
    %3 = vector.extract_strided_slice %0 {offsets = [0, 0], sizes = [1, 256], strides = [1, 1]} : vector<3x256xf32> to vector<1x256xf32>
    %4 = vector.broadcast %2 : vector<32x1xf32> to vector<32x256xf32>
    %5 = vector.broadcast %3 : vector<1x256xf32> to vector<32x256xf32>
    %6 = arith.mulf %4, %5 : vector<32x256xf32>
    %7 = vector.extract_strided_slice %1 {offsets = [0, 1], sizes = [32, 1], strides = [1, 1]} : vector<32x3xf32> to vector<32x1xf32>
    %8 = vector.extract_strided_slice %0 {offsets = [1, 0], sizes = [1, 256], strides = [1, 1]} : vector<3x256xf32> to vector<1x256xf32>
    %9 = vector.broadcast %7 : vector<32x1xf32> to vector<32x256xf32>
    %10 = vector.broadcast %8 : vector<1x256xf32> to vector<32x256xf32>
    %11 = arith.mulf %9, %10 : vector<32x256xf32>
    %12 = arith.addf %6, %11 : vector<32x256xf32>
    %13 = vector.extract_strided_slice %1 {offsets = [0, 2], sizes = [32, 1], strides = [1, 1]} : vector<32x3xf32> to vector<32x1xf32>
    %14 = vector.extract_strided_slice %0 {offsets = [2, 0], sizes = [1, 256], strides = [1, 1]} : vector<3x256xf32> to vector<1x256xf32>
    %15 = vector.broadcast %13 : vector<32x1xf32> to vector<32x256xf32>
    %16 = vector.broadcast %14 : vector<1x256xf32> to vector<32x256xf32>
    %17 = arith.mulf %15, %16 : vector<32x256xf32>
    %18 = arith.addf %12, %17 : vector<32x256xf32>
    %c0_3 = arith.constant 0 : index
    %c0_4 = arith.constant 0 : index
    %19 = vector.load %arg3[%c0_3, %c0_4] : memref<32x1xf32, #tpu.memory_space<vmem>>, vector<32x1xf32>
    %20 = vector.broadcast %19 : vector<32x1xf32> to vector<32x256xf32>
    %21 = arith.addf %18, %20 : vector<32x256xf32>
    %cst = arith.constant 0.000000e+00 : f32
    %22 = vector.broadcast %cst : f32 to vector<32x256xf32>
    %23 = arith.maximumf %21, %22 : vector<32x256xf32>
    %c0_5 = arith.constant 0 : index
    %c0_6 = arith.constant 0 : index
    %24 = vector.load %arg4[%c0_5, %c0_6] : memref<64x32xbf16, #tpu.memory_space<vmem>>, vector<64x32xbf16>
    %25 = arith.truncf %23 : vector<32x256xf32> to vector<32x256xbf16>
    %cst_7 = arith.constant dense<0.000000e+00> : vector<64x256xf32>
    %26 = tpu.matmul %24, %25, %cst_7 {dimension_numbers = #tpu.dot_dimension_numbers<[1], [0], [0], [1], [0, 0, 1, 1], [], []>} : vector<64x32xbf16>, vector<32x256xbf16>, vector<64x256xf32> -> vector<64x256xf32>
    %c0_8 = arith.constant 0 : index
    %c0_9 = arith.constant 0 : index
    %27 = vector.load %arg5[%c0_8, %c0_9] : memref<64x1xf32, #tpu.memory_space<vmem>>, vector<64x1xf32>
    %28 = vector.broadcast %27 : vector<64x1xf32> to vector<64x256xf32>
    %29 = arith.addf %26, %28 : vector<64x256xf32>
    %cst_10 = arith.constant 0.000000e+00 : f32
    %30 = vector.broadcast %cst_10 : f32 to vector<64x256xf32>
    %31 = arith.maximumf %29, %30 : vector<64x256xf32>
    %c0_11 = arith.constant 0 : index
    %c0_12 = arith.constant 0 : index
    %32 = vector.load %arg6[%c0_11, %c0_12] : memref<32x64xbf16, #tpu.memory_space<vmem>>, vector<32x64xbf16>
    %33 = arith.truncf %31 : vector<64x256xf32> to vector<64x256xbf16>
    %cst_13 = arith.constant dense<0.000000e+00> : vector<32x256xf32>
    %34 = tpu.matmul %32, %33, %cst_13 {dimension_numbers = #tpu.dot_dimension_numbers<[1], [0], [0], [1], [0, 0, 1, 1], [], []>} : vector<32x64xbf16>, vector<64x256xbf16>, vector<32x256xf32> -> vector<32x256xf32>
    %c0_14 = arith.constant 0 : index
    %c0_15 = arith.constant 0 : index
    %35 = vector.load %arg7[%c0_14, %c0_15] : memref<32x1xf32, #tpu.memory_space<vmem>>, vector<32x1xf32>
    %36 = vector.broadcast %35 : vector<32x1xf32> to vector<32x256xf32>
    %37 = arith.addf %34, %36 : vector<32x256xf32>
    %cst_16 = arith.constant 0.000000e+00 : f32
    %38 = vector.broadcast %cst_16 : f32 to vector<32x256xf32>
    %39 = arith.maximumf %37, %38 : vector<32x256xf32>
    %c0_17 = arith.constant 0 : index
    %c0_18 = arith.constant 0 : index
    %40 = vector.load %arg8[%c0_17, %c0_18] : memref<8x32xbf16, #tpu.memory_space<vmem>>, vector<8x32xbf16>
    %41 = arith.truncf %39 : vector<32x256xf32> to vector<32x256xbf16>
    %cst_19 = arith.constant dense<0.000000e+00> : vector<8x256xf32>
    %42 = tpu.matmul %40, %41, %cst_19 {dimension_numbers = #tpu.dot_dimension_numbers<[1], [0], [0], [1], [0, 0, 1, 1], [], []>} : vector<8x32xbf16>, vector<32x256xbf16>, vector<8x256xf32> -> vector<8x256xf32>
    %c0_20 = arith.constant 0 : index
    %c0_21 = arith.constant 0 : index
    %43 = vector.load %arg9[%c0_20, %c0_21] : memref<8x1xf32, #tpu.memory_space<vmem>>, vector<8x1xf32>
    %44 = vector.broadcast %43 : vector<8x1xf32> to vector<8x256xf32>
    %45 = arith.addf %42, %44 : vector<8x256xf32>
    %cst_22 = arith.constant dense<0xFF800000> : vector<256xf32>
    %46 = vector.multi_reduction <maximumf>, %45, %cst_22 [0] : vector<8x256xf32> to vector<256xf32>
    %47 = vector.shape_cast %46 : vector<256xf32> to vector<1x256xf32>
    %48 = vector.broadcast %47 : vector<1x256xf32> to vector<8x256xf32>
    %49 = arith.subf %45, %48 : vector<8x256xf32>
    %50 = math.exp %49 : vector<8x256xf32>
    %cst_23 = arith.constant dense<0.000000e+00> : vector<256xf32>
    %51 = vector.multi_reduction <add>, %50, %cst_23 [0] : vector<8x256xf32> to vector<256xf32>
    %52 = vector.shape_cast %51 : vector<256xf32> to vector<1x256xf32>
    %53 = vector.broadcast %52 : vector<1x256xf32> to vector<8x256xf32>
    %54 = arith.divf %50, %53 : vector<8x256xf32>
    %55 = arith.truncf %54 : vector<8x256xf32> to vector<8x256xbf16>
    %c0_24 = arith.constant 0 : index
    %c0_25 = arith.constant 0 : index
    %56 = vector.load %arg10[%c0_24, %c0_25] : memref<8x256xbf16, #tpu.memory_space<vmem>>, vector<8x256xbf16>
    tpu.vector_store %arg10[%c0_24, %c0_25], %55 {strides = array<i32>} : memref<8x256xbf16, #tpu.memory_space<vmem>>, vector<8x256xbf16>,
    return
  }
  func.func @transform_0(%arg0: i32) -> (i32, i32) {
    %c0_i32 = arith.constant 0 : i32
    %c0_i32_0 = arith.constant 0 : i32
    return %c0_i32, %arg0 : i32, i32
  }
  func.func @transform_1(%arg0: i32) -> (i32, i32) {
    %c0_i32 = arith.constant 0 : i32
    %c0_i32_0 = arith.constant 0 : i32
    %c0_i32_1 = arith.constant 0 : i32
    return %c0_i32, %c0_i32_0 : i32, i32
  }
  func.func @transform_2(%arg0: i32) -> (i32, i32) {
    %c0_i32 = arith.constant 0 : i32
    %c0_i32_0 = arith.constant 0 : i32
    %c0_i32_1 = arith.constant 0 : i32
    return %c0_i32, %c0_i32_0 : i32, i32
  }
  func.func @transform_3(%arg0: i32) -> (i32, i32) {
    %c0_i32 = arith.constant 0 : i32
    %c0_i32_0 = arith.constant 0 : i32
    %c0_i32_1 = arith.constant 0 : i32
    return %c0_i32, %c0_i32_0 : i32, i32
  }
  func.func @transform_4(%arg0: i32) -> (i32, i32) {
    %c0_i32 = arith.constant 0 : i32
    %c0_i32_0 = arith.constant 0 : i32
    %c0_i32_1 = arith.constant 0 : i32
    return %c0_i32, %c0_i32_0 : i32, i32
  }
  func.func @transform_5(%arg0: i32) -> (i32, i32) {
    %c0_i32 = arith.constant 0 : i32
    %c0_i32_0 = arith.constant 0 : i32
    %c0_i32_1 = arith.constant 0 : i32
    return %c0_i32, %c0_i32_0 : i32, i32
  }
  func.func @transform_6(%arg0: i32) -> (i32, i32) {
    %c0_i32 = arith.constant 0 : i32
    %c0_i32_0 = arith.constant 0 : i32
    %c0_i32_1 = arith.constant 0 : i32
    return %c0_i32, %c0_i32_0 : i32, i32
  }
  func.func @transform_7(%arg0: i32) -> (i32, i32) {
    %c0_i32 = arith.constant 0 : i32
    %c0_i32_0 = arith.constant 0 : i32
    %c0_i32_1 = arith.constant 0 : i32
    return %c0_i32, %c0_i32_0 : i32, i32
  }
  func.func @transform_8(%arg0: i32) -> (i32, i32) {
    %c0_i32 = arith.constant 0 : i32
    %c0_i32_0 = arith.constant 0 : i32
    %c0_i32_1 = arith.constant 0 : i32
    return %c0_i32, %c0_i32_0 : i32, i32
  }
  func.func @transform_9(%arg0: i32) -> (i32, i32) {
    %c0_i32 = arith.constant 0 : i32
    %c0_i32_0 = arith.constant 0 : i32
    return %c0_i32, %arg0 : i32, i32
  }
}

</mosaic_0001>

<bundles_post_ra>
// kernel: skin_model_forward.1
= control target key start
LH: loop header
LB: loop body
LE: loop exit
PB: predicated region body
PF: predicated region fallthrough
CT: control target
= control target key end

     0   :  { %v666_v2 = vmov 2   ;;  %v667_v3 = vmov 1   ;;  %s820_s0 = inlined_call_operand.vmem [shape: f32[3,256], index: 0, kind: input, shape index: {}]   ;;  %s821_s1 = inlined_call_operand.vmem [shape: f32[32,3], index: 1, kind: input, shape index: {}]   ;;  %s822_s2 = inlined_call_operand.vmem [shape: f32[32,1], index: 2, kind: input, shape index: {}]   ;;  %s823_s3 = inlined_call_operand.vmem [shape: bf16[64,32], index: 3, kind: input, shape index: {}]   ;;  %s824_s4 = inlined_call_operand.vmem [shape: f32[64,1], index: 4, kind: input, shape index: {}]   ;;  %s825_s5 = inlined_call_operand.vmem [shape: bf16[32,64], index: 5, kind: input, shape index: {}]   ;;  %s826_s6 = inlined_call_operand.vmem [shape: f32[32,1], index: 6, kind: input, shape index: {}]   ;;  %s827_s7 = inlined_call_operand.vmem [shape: bf16[8,32], index: 7, kind: input, shape index: {}]   ;;  %s828_s8 = inlined_call_operand.vmem [shape: f32[8,1], index: 8, kind: input, shape index: {}]   ;;  %s829_s9 = inlined_call_operand.hbm [shape: bf16[8,256], index: 9, kind: output, shape index: {}]  }
   0x1   :  { %v37_v0 = vld [vmem:[%s821_s1 + $0x10] sm:$0xff]  ;;  %v36_v1 = vld [vmem:[%s821_s1 + $0x8] sm:$0xff]  ;;  %623 = vset.pattern.permute.xlu2 %v666_v2  ;;  %626 = vset.pattern.permute.xlu0 %v667_v3 }
   0x2   :  { %14 = vsyncpa [#allocation3], 0  ;;  %622 = vset.pattern.permute.xlu1 %v667_v3  ;;  %121 = vperm.xlu2 %623, %v37_v0   ;;  %v38_v4 = vld [vmem:[%s821_s1 + $0x18] sm:$0xff]  ;;  %v668_v5 = vmov 0   ;;  %v35_v6 = vld [vmem:[%s821_s1] sm:$0xff]  ;;  %vm270_vm0 = vcmask 261120  }
   0x3   :  { %83 = vperm.xlu1 %622, %v37_v0   ;;  %79 = vperm.xlu0 %626, %v36_v1   ;;  %v150_v7 = vld [vmem:[%s822_s2] sm:$0xff]  ;;  %v152_v8 = vld [vmem:[%s822_s2 + $0x10] sm:$0xff]  ;;  %v153_v9 = vld [vmem:[%s822_s2 + $0x18] sm:$0xff]  ;;  %vm403_vm1 = vcmask 523264   ;;  %s565_s18 = sshll.u32 %s829_s9, 4  ;;  %s566_s18 = int_to_ptr.hbm [resolvable:$true] %s565_s18 }
   0x4   :  { %v207_v10 = vld [vmem:[%s824_s4 + $0x28] sm:$0xff]  ;;  %v208_v12 = vld [vmem:[%s824_s4 + $0x30] sm:$0xff]  ;;  %v202_v13 = vld [vmem:[%s824_s4] sm:$0xff] }
   0x5   :  { %v151_v11 = vld [vmem:[%s822_s2 + $0x8] sm:$0xff]  ;;  %v209_v14 = vld [vmem:[%s824_s4 + $0x38] sm:$0xff]  ;;  %v206_v15 = vld [vmem:[%s824_s4 + $0x20] sm:$0xff] }
   0x6   :  { %v372_v16 = vld [vmem:[%s826_s6 + $0x18] sm:$0xff]  ;;  %v204_v17 = vld [vmem:[%s824_s4 + $0x10] sm:$0xff]  ;;  %v461_v19 = vld [vmem:[%s828_s8] sm:$0xff] }
   0x7   :  { %v205_v18 = vld [vmem:[%s824_s4 + $0x18] sm:$0xff]  ;;  %v203_v20 = vld [vmem:[%s824_s4 + $0x8] sm:$0xff]  ;;  %v371_v21 = vld [vmem:[%s826_s6 + $0x10] sm:$0xff] }
   0x8   :  { %v369_v22 = vld [vmem:[%s826_s6] sm:$0xff]  ;;  %v370_v23 = vld [vmem:[%s826_s6 + $0x8] sm:$0xff] }
   0x9   :  { %v34_v31 = vld [vmem:[%s820_s0] sm:$0x77] }
   0xa   :  { %125 = vperm.xlu2 %623, %v38_v4   ;;  %v60_v32 = vperm.slane %v34_v31, 0  ;;  %v61_v33 = vperm.slane %v34_v31, 4  ;;  %v90_v35 = vperm.slane %v34_v31, 1  ;;  %v91_v36 = vperm.slane %v34_v31, 5 }
   0xb   :  { %87 = vperm.xlu1 %622, %v38_v4   ;;  %627 = vset.pattern.permute.xlu0 %v668_v5  ;;  %v128_v38 = vperm.slane %v34_v31, 2  ;;  %v129_v39 = vperm.slane %v34_v31, 6 }
   0xc   :  { %51 = vperm.xlu0 %627, %v37_v0   ;;  %v64_v40 = vperm.slane %v60_v32, 0  ;;  %v65_v41 = vperm.slane %v61_v33, 0  ;;  %v94_v42 = vperm.slane %v90_v35, 1  ;;  %v95_v43 = vperm.slane %v91_v36, 1 }
   0xd   :  { %v132_v47 = vperm.slane %v128_v38, 2  ;;  %v133_v48 = vperm.slane %v129_v39, 2 }
  0x12   :  { %625 = vset.pattern.permute.xlu2 %v667_v3 }
  0x13   :  { %624 = vset.pattern.permute.xlu1 %v668_v5  ;;  %75 = vperm.xlu2 %625, %v35_v6  }
  0x14   :  { %56 = vperm.xlu0 %627, %v38_v4   ;;  %46 = vperm.xlu1 %624, %v36_v1  }
  0x1b   :  { %629 = vset.pattern.permute.xlu2 %v666_v2 }
  0x1c   :  { %628 = vset.pattern.permute.xlu1 %v666_v2  ;;  %41 = vperm.xlu0 %627, %v35_v6  }
  0x1d   :  { %113 = vperm.xlu1 %628, %v35_v6   ;;  %117 = vperm.xlu2 %629, %v36_v1  }
  0x24   :  { %156 = vperm.xlu0 %627, %v150_v7  }
  0x25   :  { %630 = vset.pattern.permute.xlu1 %v668_v5  ;;  %631 = vset.pattern.permute.xlu2 %v668_v5 }
  0x26   :  { %166 = vperm.xlu1 %630, %v152_v8   ;;  %171 = vperm.xlu2 %631, %v153_v9  }
  0x2c   :  { %237 = vperm.xlu0 %627, %v207_v10  }
  0x2e   :  { %161 = vperm.xlu1 %630, %v151_v11   ;;  %242 = vperm.xlu2 %631, %v208_v12  }
  0x34   :  { %212 = vperm.xlu0 %627, %v202_v13  }
  0x36   :  { %247 = vperm.xlu1 %630, %v209_v14   ;;  %232 = vperm.xlu2 %631, %v206_v15  }
  0x3c   :  { %390 = vperm.xlu0 %627, %v372_v16  }
  0x3e   :  { %222 = vperm.xlu1 %630, %v204_v17   ;;  %227 = vperm.xlu2 %631, %v205_v18  }
  0x44   :  { %464 = vperm.xlu0 %627, %v461_v19  }
  0x46   :  { %217 = vperm.xlu1 %630, %v203_v20   ;;  %385 = vperm.xlu2 %631, %v371_v21  }
  0x4e   :  { %375 = vperm.xlu1 %630, %v369_v22   ;;  %380 = vperm.xlu2 %631, %v370_v23  }
  0x5c   :  { %v122_v24 = vpop.permute.xlu2 %121 }
  0x5d   :  { %v138_v1 = vmul.f32 %v132_v47, %v122_v24  ;;  %v139_v2 = vmul.f32 %v133_v48, %v122_v24 }
  0x64   :  { %v126_v27 = vpop.permute.xlu2 %125 }
  0x65   :  { %v140_v56 = vmul.f32 %v132_v47, %v126_v27  ;;  %v141_v57 = vmul.f32 %v133_v48, %v126_v27 }
  0x6d   :  { %v76_v30 = vpop.permute.xlu2 %75 }
  0x6e   :  { %v96_v5 = vmul.f32 %v94_v42, %v76_v30  ;;  %v97_v6 = vmul.f32 %v95_v43, %v76_v30 }
  0x75   :  { %v84_v25 = vpop.permute.xlu1 %83  ;;  %v80_v26 = vpop.permute.xlu0 %79 }
  0x76   :  { %v100_v58 = vmul.f32 %v94_v42, %v84_v25  ;;  %v101_v59 = vmul.f32 %v95_v43, %v84_v25  ;;  %v98_v14 = vmul.f32 %v94_v42, %v80_v26  ;;  %v99_v15 = vmul.f32 %v95_v43, %v80_v26 }
  0x77   :  { %v118_v46 = vpop.permute.xlu2 %117 }
  0x78   :  { %v136_v23 = vmul.f32 %v132_v47, %v118_v46  ;;  %v137_v24 = vmul.f32 %v133_v48, %v118_v46 }
  0x7d   :  { %v88_v28 = vpop.permute.xlu1 %87 }
  0x7e   :  { %v52_v29 = vpop.permute.xlu0 %51  ;;  %v102_v49 = vmul.f32 %v94_v42, %v88_v28  ;;  %v103_v50 = vmul.f32 %v95_v43, %v88_v28 }
  0x7f   :  { %v70_v51 = vmul.f32 %v64_v40, %v52_v29  ;;  %v71_v52 = vmul.f32 %v65_v41, %v52_v29 }
  0x80   :  { %v172_v7 = vpop.permute.xlu2 %171 }
  0x81   :  { %v108_v61 = vadd.f32 %v100_v58, %v70_v51  ;;  %v109_v62 = vadd.f32 %v101_v59, %v71_v52  ;;  %v614_v51 = vld [vmem:[%s823_s3 + $0x10] sm:$0xff]  ;;  %v615_v52 = vld [vmem:[%s823_s3 + $0x18] sm:$0xff] }
  0x83   :  { %v146_v10 = vadd.f32 %v138_v1, %v108_v61  ;;  %v147_v11 = vadd.f32 %v139_v2, %v109_v62 }
  0x86   :  { %v47_v34 = vpop.permute.xlu1 %46  ;;  %v57_v37 = vpop.permute.xlu0 %56 }
  0x87   :  { %v72_v44 = vmul.f32 %v64_v40, %v57_v37  ;;  %v73_v45 = vmul.f32 %v65_v41, %v57_v37  ;;  %v68_v8 = vmul.f32 %v64_v40, %v47_v34  ;;  %v69_v9 = vmul.f32 %v65_v41, %v47_v34 }
  0x89   :  { %v110_v53 = vadd.f32 %v102_v49, %v72_v44  ;;  %v111_v54 = vadd.f32 %v103_v50, %v73_v45  ;;  %v106_v25 = vadd.f32 %v98_v14, %v68_v8  ;;  %v107_v27 = vadd.f32 %v99_v15, %v69_v9  ;;  %v612_v49 = vld [vmem:[%s823_s3] sm:$0xff]  ;;  %v613_v50 = vld [vmem:[%s823_s3 + $0x8] sm:$0xff] }
  0x8b   :  { %v148_v63 = vadd.f32 %v140_v56, %v110_v53  ;;  %v149_v0 = vadd.f32 %v141_v57, %v111_v54  ;;  %v144_v36 = vadd.f32 %v136_v23, %v106_v25  ;;  %v145_v39 = vadd.f32 %v137_v24, %v107_v27 }
  0x8d   :  { %v180_v12 = vadd.f32 %v172_v7, %v148_v63  ;;  %v181_v13 = vadd.f32 %v172_v7, %v149_v0  ;;  %v243_v63 = vpop.permute.xlu2 %242 }
  0x8e   :  { %v42_v60 = vpop.permute.xlu0 %41 }
  0x8f   :  { %v114_v55 = vpop.permute.xlu1 %113  ;;  %v66_v3 = vmul.f32 %v64_v40, %v42_v60  ;;  %v67_v4 = vmul.f32 %v65_v41, %v42_v60  ;;  %v188_v29 = vmax.f32 %v180_v12, 0.0  ;;  %v189_v31 = vmax.f32 %v181_v13, 0.0 }
  0x90   :  { %v134_v16 = vmul.f32 %v132_v47, %v114_v55  ;;  %v135_v17 = vmul.f32 %v133_v48, %v114_v55 }
  0x91   :  { %v104_v19 = vadd.f32 %v96_v5, %v66_v3  ;;  %v105_v20 = vadd.f32 %v97_v6, %v67_v4 }
  0x93   :  { %v142_v33 = vadd.f32 %v134_v16, %v104_v19  ;;  %v143_v34 = vadd.f32 %v135_v17, %v105_v20 }
  0x95   :  { %v233_v5 = vpop.permute.xlu2 %232 }
  0x96   :  { %v157_v32 = vpop.permute.xlu0 %156 }
  0x97   :  { %v174_v37 = vadd.f32 %v157_v32, %v142_v33  ;;  %v175_v38 = vadd.f32 %v157_v32, %v143_v34 }
  0x98   :  { %v167_v18 = vpop.permute.xlu1 %166 }
  0x99   :  { %v178_v21 = vadd.f32 %v167_v18, %v146_v10  ;;  %v179_v22 = vadd.f32 %v167_v18, %v147_v11  ;;  %v182_v43 = vmax.f32 %v174_v37, 0.0  ;;  %v183_v44 = vmax.f32 %v175_v38, 0.0 }
  0x9b   :  { %v186_v28 = vmax.f32 %v178_v21, 0.0  ;;  %v187_v30 = vmax.f32 %v179_v22, 0.0 }
  0x9d   :  { %v200_v35 = vpack.c.bf16 %v188_v29, %v186_v28  ;;  %v201_v26 = vpack.c.bf16 %v189_v31, %v187_v30  ;;  %v228_v18 = vpop.permute.xlu2 %227 }
  0x9e   :  { %v238_v7 = vpop.permute.xlu0 %237 }
  0x9f   :  { %289 = vmatpush.bf16.msra.mxu0 %v200_v35  ;;  %318 = vmatpush.bf16.msra.mxu1 %v201_v26 }
  0xa0   :  { %v162_v40 = vpop.permute.xlu1 %161 }
  0xa1   :  { %v176_v41 = vadd.f32 %v162_v40, %v144_v36  ;;  %v177_v42 = vadd.f32 %v162_v40, %v145_v39 }
  0xa3   :  { %v184_v45 = vmax.f32 %v176_v41, 0.0  ;;  %v185_v46 = vmax.f32 %v177_v42, 0.0 }
  0xa5   :  { %v198_v47 = vpack.c.bf16 %v184_v45, %v182_v43  ;;  %v199_v48 = vpack.c.bf16 %v185_v46, %v183_v44 }
  0xa6   :  { %v213_v40 = vpop.permute.xlu0 %212 }
  0xa7   :  { %290 = vmatpush.bf16.msra.mxu0 %v198_v47  ;;  %319 = vmatpush.bf16.msra.mxu1 %v199_v48 }
  0xa8   :  { %v248_v2 = vpop.permute.xlu1 %247 }
  0xaa   :  { %590 = vmatmul.msk.bf16.vlgmr.msra.gmra.mxu0 %vm270_vm0, %v612_v49  ;;  %594 = vmatmul.msk.bf16.vlgmr.msra.gmra.mxu1 %vm270_vm0, %v612_v49 }
  0xb0   :  { %v223_v6 = vpop.permute.xlu1 %222 }
  0xb8   :  { %v218_v30 = vpop.permute.xlu1 %217 }
  0xba   :  { %591 = vmatmul.msk.bf16.gmra.mxu0 %vm270_vm0, %v613_v50  ;;  %595 = vmatmul.msk.bf16.gmra.mxu1 %vm270_vm0, %v613_v50 }
  0xca   :  { %592 = vmatmul.msk.bf16.gmra.mxu0 %vm270_vm0, %v614_v51  ;;  %596 = vmatmul.msk.bf16.gmra.mxu1 %vm270_vm0, %v614_v51 }
  0xda   :  { %593 = vmatmul.msk.bf16.gmra.mxu0 %vm270_vm0, %v615_v52  ;;  %597 = vmatmul.msk.bf16.gmra.mxu1 %vm270_vm0, %v615_v52 }
 0x127   :  { %v292_v53 = vpop.f32.mrf.mxu0  ;;  %v321_v54 = vpop.f32.mrf.mxu1 }
 0x128   :  { %v293_v41 = vadd.f32 %v292_v53, %v213_v40  ;;  %v322_v42 = vadd.f32 %v321_v54, %v213_v40  ;;  %v617_v53 = vld [vmem:[%s825_s5 + $0x8] sm:$0xff] }
 0x12a   :  { %v341_v49 = vmax.f32 %v293_v41, 0.0  ;;  %v342_v50 = vmax.f32 %v322_v42, 0.0 }
 0x12f   :  { %v294_v55 = vpop.f32.mrf.mxu0  ;;  %v323_v56 = vpop.f32.mrf.mxu1 }
 0x130   :  { %v295_v35 = vadd.f32 %v294_v55, %v218_v30  ;;  %v324_v26 = vadd.f32 %v323_v56, %v218_v30  ;;  %v616_v55 = vld [vmem:[%s825_s5] sm:$0xff] }
 0x132   :  { %v343_v45 = vmax.f32 %v295_v35, 0.0  ;;  %v344_v46 = vmax.f32 %v324_v26, 0.0 }
 0x134   :  { %v361_v51 = vpack.c.bf16 %v343_v45, %v341_v49  ;;  %v362_v52 = vpack.c.bf16 %v344_v46, %v342_v50 }
 0x137   :  { %v297_v57 = vpop.f32.mrf.mxu0  ;;  %v326_v58 = vpop.f32.mrf.mxu1 }
 0x138   :  { %v298_v31 = vadd.f32 %v297_v57, %v223_v6  ;;  %v327_v32 = vadd.f32 %v326_v58, %v223_v6 }
 0x13a   :  { %v345_v43 = vmax.f32 %v298_v31, 0.0  ;;  %v346_v44 = vmax.f32 %v327_v32, 0.0 }
 0x13f   :  { %v299_v59 = vpop.f32.mrf.mxu0  ;;  %v328_v60 = vpop.f32.mrf.mxu1 }
 0x140   :  { %v300_v23 = vadd.f32 %v299_v59, %v228_v18  ;;  %v329_v24 = vadd.f32 %v328_v60, %v228_v18  ;;  %v386_v59 = vpop.permute.xlu2 %385 }
 0x142   :  { %v347_v36 = vmax.f32 %v300_v23, 0.0  ;;  %v348_v37 = vmax.f32 %v329_v24, 0.0  ;;  %v456_v23 = vld [vmem:[%s827_s7] sm:$0xf]  ;;  %s669_s7 = smov [#allocation2]  }
 0x143   :  { %s563_s15 = sshll.u32 %s669_s7, 4  ;;  %s564_s15 = int_to_ptr.vmem [resolvable:$true] %s563_s15 }
 0x144   :  { %v363_v47 = vpack.c.bf16 %v347_v36, %v345_v43  ;;  %v364_v48 = vpack.c.bf16 %v348_v37, %v346_v44 }
 0x147   :  { %v302_v61 = vpop.f32.mrf.mxu0  ;;  %v331_v62 = vpop.f32.mrf.mxu1 }
 0x148   :  { %v303_v16 = vadd.f32 %v302_v61, %v233_v5  ;;  %v332_v17 = vadd.f32 %v331_v62, %v233_v5  ;;  %v381_v62 = vpop.permute.xlu2 %380 }
 0x14a   :  { %v349_v33 = vmax.f32 %v303_v16, 0.0  ;;  %v350_v34 = vmax.f32 %v332_v17, 0.0 }
 0x14f   :  { %v304_v0 = vpop.f32.mrf.mxu0  ;;  %v333_v1 = vpop.f32.mrf.mxu1 }
 0x150   :  { %v305_v12 = vadd.f32 %v304_v0, %v238_v7  ;;  %v334_v13 = vadd.f32 %v333_v1, %v238_v7 }
 0x152   :  { %v351_v25 = vmax.f32 %v305_v12, 0.0  ;;  %v352_v27 = vmax.f32 %v334_v13, 0.0 }
 0x154   :  { %v365_v38 = vpack.c.bf16 %v351_v25, %v349_v33  ;;  %v366_v39 = vpack.c.bf16 %v352_v27, %v350_v34 }
 0x157   :  { %v307_v3 = vpop.f32.mrf.mxu0  ;;  %v336_v4 = vpop.f32.mrf.mxu1 }
 0x158   :  { %v308_v8 = vadd.f32 %v307_v3, %v243_v63  ;;  %v337_v9 = vadd.f32 %v336_v4, %v243_v63  ;;  %v391_v63 = vpop.permute.xlu0 %390  ;;  %v376_v4 = vpop.permute.xlu1 %375 }
 0x15a   :  { %v353_v19 = vmax.f32 %v308_v8, 0.0  ;;  %v354_v20 = vmax.f32 %v337_v9, 0.0 }
 0x15f   :  { %v309_v10 = vpop.f32.mrf.mxu0  ;;  %v338_v11 = vpop.f32.mrf.mxu1 }
 0x160   :  { %v310_v14 = vadd.f32 %v309_v10, %v248_v2  ;;  %v339_v15 = vadd.f32 %v338_v11, %v248_v2  ;;  %v465_v24 = vpop.permute.xlu0 %464 }
 0x162   :  { %v355_v21 = vmax.f32 %v310_v14, 0.0  ;;  %v356_v22 = vmax.f32 %v339_v15, 0.0 }
 0x164   :  { %v367_v28 = vpack.c.bf16 %v355_v21, %v353_v19  ;;  %v368_v29 = vpack.c.bf16 %v356_v22, %v354_v20 }
 0x166   :  { %414 = vmatpush.bf16.msra.mxu2 %v367_v28  ;;  %433 = vmatpush.bf16.msra.mxu3 %v368_v29 }
 0x16a   :  { %415 = vmatpush.bf16.msra.mxu2 %v365_v38  ;;  %434 = vmatpush.bf16.msra.mxu3 %v366_v39 }
 0x16e   :  { %416 = vmatpush.bf16.msra.mxu2 %v363_v47  ;;  %435 = vmatpush.bf16.msra.mxu3 %v364_v48 }
 0x172   :  { %417 = vmatpush.bf16.msra.mxu2 %v361_v51  ;;  %436 = vmatpush.bf16.msra.mxu3 %v362_v52 }
 0x175   :  { %606 = vmatmul.msk.bf16.vlgmr.msra.gmra.mxu2 %vm403_vm1, %v616_v55  ;;  %608 = vmatmul.msk.bf16.vlgmr.msra.gmra.mxu3 %vm403_vm1, %v616_v55 }
 0x185   :  { %607 = vmatmul.msk.bf16.gmra.mxu2 %vm403_vm1, %v617_v53  ;;  %609 = vmatmul.msk.bf16.gmra.mxu3 %vm403_vm1, %v617_v53 }
 0x1f8   :  { %v419_v54 = vpop.f32.mrf.mxu2  ;;  %v438_v56 = vpop.f32.mrf.mxu3 }
 0x1f9   :  { %v420_v9 = vadd.f32 %v419_v54, %v376_v4  ;;  %v439_v10 = vadd.f32 %v438_v56, %v376_v4 }
 0x1fb   :  { %v448_v19 = vmax.f32 %v420_v9, 0.0  ;;  %v449_v20 = vmax.f32 %v439_v10, 0.0 }
 0x200   :  { %v421_v57 = vpop.f32.mrf.mxu2  ;;  %v440_v58 = vpop.f32.mrf.mxu3 }
 0x201   :  { %v422_v5 = vadd.f32 %v421_v57, %v381_v62  ;;  %v441_v6 = vadd.f32 %v440_v58, %v381_v62 }
 0x203   :  { %v450_v15 = vmax.f32 %v422_v5, 0.0  ;;  %v451_v16 = vmax.f32 %v441_v6, 0.0 }
 0x205   :  { %v457_v21 = vpack.c.bf16 %v450_v15, %v448_v19  ;;  %v458_v22 = vpack.c.bf16 %v451_v16, %v449_v20 }
 0x208   :  { %v424_v60 = vpop.f32.mrf.mxu2  ;;  %v443_v61 = vpop.f32.mrf.mxu3 }
 0x209   :  { %v425_v0 = vadd.f32 %v424_v60, %v386_v59  ;;  %v444_v1 = vadd.f32 %v443_v61, %v386_v59 }
 0x20b   :  { %v452_v11 = vmax.f32 %v425_v0, 0.0  ;;  %v453_v12 = vmax.f32 %v444_v1, 0.0 }
 0x210   :  { %v426_v2 = vpop.f32.mrf.mxu2  ;;  %v445_v3 = vpop.f32.mrf.mxu3 }
 0x211   :  { %v427_v7 = vadd.f32 %v426_v2, %v391_v63  ;;  %v446_v8 = vadd.f32 %v445_v3, %v391_v63 }
 0x213   :  { %v454_v13 = vmax.f32 %v427_v7, 0.0  ;;  %v455_v14 = vmax.f32 %v446_v8, 0.0 }
 0x215   :  { %v459_v17 = vpack.c.bf16 %v454_v13, %v452_v11  ;;  %v460_v18 = vpack.c.bf16 %v455_v14, %v453_v12 }
 0x217   :  { %476 = vmatpush.bf16.msrb.mxu2 %v459_v17  ;;  %489 = vmatpush.bf16.msrb.mxu3 %v460_v18 }
 0x21b   :  { %477 = vmatpush.bf16.msrb.mxu2 %v457_v21  ;;  %490 = vmatpush.bf16.msrb.mxu3 %v458_v22 }
 0x21e   :  { %610 = vmatmul.msk.bf16.vlgmr.msrb.gmra.mxu2 %vm270_vm0, %v456_v23  ;;  %611 = vmatmul.msk.bf16.vlgmr.msrb.gmra.mxu3 %vm270_vm0, %v456_v23 }
 0x2a1   :  { %v479_v25 = vpop.f32.mrf.mxu2  ;;  %v492_v27 = vpop.f32.mrf.mxu3 }
 0x2a2   :  { %v480_v28 = vadd.f32 %v479_v25, %v465_v24  ;;  %v493_v29 = vadd.f32 %v492_v27, %v465_v24 }
 0x2a4   :  { %v496_v30 = vrot.slane %v480_v28, 4  ;;  %v502_v31 = vrot.slane %v493_v29, 4 }
 0x2a6   :  { %v497_v32 = vmax.f32 %v480_v28, %v496_v30  ;;  %v503_v33 = vmax.f32 %v493_v29, %v502_v31 }
 0x2a8   :  { %v498_v34 = vrot.slane %v497_v32, 2  ;;  %v504_v35 = vrot.slane %v503_v33, 2 }
 0x2a9   :  { %v481_v26 = vpop.f32.mrf.mxu2  ;;  %v494_v36 = vpop.f32.mrf.mxu3 }
 0x2aa   :  { %v499_v37 = vmax.f32 %v497_v32, %v498_v34  ;;  %v505_v38 = vmax.f32 %v503_v33, %v504_v35 }
 0x2ac   :  { %v500_v39 = vrot.slane %v499_v37, 1  ;;  %v506_v40 = vrot.slane %v505_v38, 1 }
 0x2ae   :  { %v501_v41 = vmax.f32 %v499_v37, %v500_v39  ;;  %v507_v42 = vmax.f32 %v505_v38, %v506_v40 }
 0x2b0   :  { %v508_v43 = vsub.f32 %v480_v28, %v501_v41  ;;  %v509_v44 = vsub.f32 %v493_v29, %v507_v42 }
 0x2b2   :  { %v510_v45 = vmul.f32 1.442695, %v508_v43  ;;  %v512_v46 = vmul.f32 1.442695, %v509_v44 }
 0x2b4   :  { %632 = vpow2.f32 %v510_v45 }
 0x2b5   :  { %634 = vpow2.f32 %v512_v46 }
 0x2ba   :  { %v633_v47 = vpop.eup %632 }
 0x2bb   :  { %v635_v48 = vpop.eup %634  ;;  %v514_v49 = vrot.slane %v633_v47, 4 }
 0x2bc   :  { %v520_v50 = vrot.slane %v635_v48, 4 }
 0x2bd   :  { %v515_v51 = vadd.f32 %v633_v47, %v514_v49 }
 0x2be   :  { %v521_v52 = vadd.f32 %v635_v48, %v520_v50 }
 0x2bf   :  { %v516_v55 = vrot.slane %v515_v51, 2 }
 0x2c0   :  { %v522_v53 = vrot.slane %v521_v52, 2 }
 0x2c1   :  { %v517_v54 = vadd.f32 %v516_v55, %v515_v51 }
 0x2c2   :  { %v523_v56 = vadd.f32 %v522_v53, %v521_v52 }
 0x2c3   :  { %v518_v57 = vrot.slane %v517_v54, 1 }
 0x2c4   :  { %v524_v58 = vrot.slane %v523_v56, 1 }
 0x2c5   :  { %v519_v59 = vadd.f32 %v518_v57, %v517_v54 }
 0x2c6   :  { %v525_v60 = vadd.f32 %v524_v58, %v523_v56 }
 0x2c7   :  { %636 = vrcp.f32 %v519_v59  ;;  %v537_v2 = vand.u32 2147483648, %v519_v59  ;;  %v535_v5 = vand.u32 2147483647, %v519_v59  ;;  %vm531_vm4 = vweird.f32 %v519_v59 }
 0x2c8   :  { %638 = vrcp.f32 %v525_v60  ;;  %v552_v6 = vand.u32 2147483648, %v525_v60  ;;  %v550_v8 = vand.u32 2147483647, %v525_v60  ;;  %vm546_vm6 = vweird.f32 %v525_v60 }
 0x2c9   :  { %v538_v10 = vor.u32 1.1754944e-38, %v537_v2  ;;  %vm536_vm7 = vcmp.eq.f32.partialorder %v535_v5, 8.507059e+37 }
 0x2ca   :  { %v553_v13 = vor.u32 1.1754944e-38, %v552_v6  ;;  %vm551_vm9 = vcmp.eq.f32.partialorder %v550_v8, 8.507059e+37 }
 0x2cd   :  { %v637_v61 = vpop.eup %636 }
 0x2ce   :  { %v639_v62 = vpop.eup %638  ;;  %v527_v63 = vmul.f32 %v637_v61, %v519_v59  ;;  %vm532_vm2 = vweird.f32 %v637_v61 }
 0x2cf   :  { %v542_v0 = vmul.f32 %v639_v62, %v525_v60  ;;  %vm547_vm3 = vweird.f32 %v639_v62  ;;  %vm533_vm5 = vmor %vm531_vm4, %vm532_vm2 }
 0x2d0   :  { %v528_v1 = vsub.f32 1.0, %v527_v63  ;;  %vm548_vm8 = vmor %vm546_vm6, %vm547_vm3 }
 0x2d1   :  { %v543_v3 = vsub.f32 1.0, %v542_v0 }
 0x2d2   :  { %v529_v4 = vmul.f32 %v637_v61, %v528_v1 }
 0x2d3   :  { %v544_v7 = vmul.f32 %v639_v62, %v543_v3 }
 0x2d4   :  { %v530_v9 = vadd.f32 %v637_v61, %v529_v4 }
 0x2d5   :  { %v545_v11 = vadd.f32 %v639_v62, %v544_v7 }
 0x2d6   :  { %v534_v12 = vsel %vm533_vm5, %v637_v61, %v530_v9 }
 0x2d7   :  { %v539_v14 = vsel %vm536_vm7, %v538_v10, %v534_v12  ;;  %v549_v15 = vsel %vm548_vm8, %v639_v62, %v545_v11 }
 0x2d8   :  { %v540_v16 = vmul.f32 %v633_v47, %v539_v14  ;;  %v554_v17 = vsel %vm551_vm9, %v553_v13, %v549_v15 }
 0x2d9   :  { %v555_v18 = vmul.f32 %v635_v48, %v554_v17 }
 0x2db   :  { %v556_v19 = vpack.c.bf16 %v555_v18, %v540_v16 }
 0x2dd   :  { %557 = vst [vmem:[#allocation2] sm:$0xff] %v556_v19 }
 0x2de   :  { %568 = dma.vmem_to_hbm [thread:$0]  %s564_s15, 128, %s566_s18, [#allocation3]  }
 0x2df   :  { %664 = dma.done.wait [#allocation3], 128  }
 0x2e0   :  { %665 = vsyncadd [#allocation3], 4294967168 }
 0x2e1   :  { %573 = vsyncpa [#allocation3], 1 }

</bundles_post_ra>
